<compile_context>
chip_gen: v5e
topology: v5e:2x2
jax: 0.10.0
libtpu: 0.0.40
codegen_flags: <defaults>
</compile_context>

<pallas_src>
import functools

import jax
import jax.numpy as jnp
from jax.experimental import pallas as pl
from jax.experimental.pallas import tpu as pltpu


def cross_attention_kernel(x_ref, enc_ref,
                           wq_ref, bq_ref,
                           wkv_ref, bkv_ref,
                           wo_ref, bo_ref,
                           out_ref,
                           *, n_heads: int, d_k: int, scale: float):
    _, T, C = x_ref.shape
    _, T_enc, _ = enc_ref.shape
    H = n_heads

    x = x_ref[0]        # (T, C)      current batch element
    enc = enc_ref[0]    # (T_enc, C)

    # ---- Flat, full-depth projections --------------------------------------
    # Weight-stationary NT contractions: out^T = W @ act^T without an explicit
    # activation transpose.  Rows of the result are out-features in head-major
    # order, so the head split below is a pure leading/sublane reshape.
    qT = jnp.einsum("ck,tk->ct", wq_ref[...], x,
                    preferred_element_type=jnp.float32) + bq_ref[...]       # (C, T)
    qT = qT * scale          # fold 1/sqrt(d_k) into q (T*C muls vs T*T_enc)

    # Fused K/V projection: one (2C, C) x (C, T_enc) matmul.
    kvT = jnp.einsum("ck,sk->cs", wkv_ref[...], enc,
                     preferred_element_type=jnp.float32) + bkv_ref[...]     # (2C, T_enc)

    # ---- Head split: sublane-tile-aligned reshapes / slices only -----------
    qh = qT.reshape(H, d_k, T)               # (H, d_k, T)
    kh = kvT[:C].reshape(H, d_k, T_enc)      # (H, d_k, T_enc)  (sublane slice)
    vh = kvT[C:].reshape(H, d_k, T_enc)      # (H, d_k, T_enc)

    # ---- Scaled dot-product attention, batched over heads ------------------
    qh_t = jnp.swapaxes(qh, 1, 2)            # (H, T, d_k)  batched minor transpose
    s = jnp.einsum("htd,hds->hts", qh_t, kh,
                   preferred_element_type=jnp.float32)       # (H, T, T_enc)
    m = jnp.max(s, axis=-1, keepdims=True)
    p = jnp.exp(s - m)
    p = p * pl.reciprocal(jnp.sum(p, axis=-1, keepdims=True), approx=True)

    # PV computed transposed so the head merge is again a leading-dim reshape:
    # oT[h, d, t] = sum_s vh[h, d, s] * p[h, t, s]
    oT = jnp.einsum("hds,hts->hdt", vh, p,
                    preferred_element_type=jnp.float32)      # (H, d_k, T)

    # ---- Joint output projection over (head, d_k) = C -----------------------
    o_flatT = oT.reshape(C, T)                               # head-major rows == reference layout
    outT = jnp.dot(wo_ref[...], o_flatT,
                   preferred_element_type=jnp.float32) + bo_ref[...]        # (C, T)
    out_ref[0] = outT.T.astype(out_ref.dtype)                # (T, C)


def cross_attention(x, enc, params, *, n_heads: int):
    B, T, C = x.shape
    _, T_enc, _ = enc.shape
    assert C % n_heads == 0
    d_k = C // n_heads
    # The zero-relayout head split relies on d_k being a multiple of the f32
    # sublane tile (8); true for this config and for realistic d_k (64/128).
    assert d_k % 8 == 0, "d_k must be a multiple of 8"

    wq, bq = params["wq"], params["bq"]
    wk, bk = params["wk"], params["bk"]
    wv, bv = params["wv"], params["bv"]
    wo, bo = params["wo"], params["bo"]

    # nn.Linear weights are (out_features, in_features); the kernel consumes
    # them as-is (weight-stationary).  K and V weights/biases are fused by
    # stacking rows, so one matmul covers both projections.
    wkv = jnp.concatenate([wk, wv], axis=0)                      # (2C, C)
    bq_c = bq.reshape(C, 1)
    bkv_c = jnp.concatenate([bk, bv], axis=0).reshape(2 * C, 1)
    bo_c = bo.reshape(C, 1)

    kernel = functools.partial(cross_attention_kernel,
                               n_heads=n_heads, d_k=d_k,
                               scale=1.0 / (d_k ** 0.5))

    const = lambda shape: pl.BlockSpec(shape, lambda b: (0, 0))

    return pl.pallas_call(
        kernel,
        out_shape=jax.ShapeDtypeStruct((B, T, C), x.dtype),
        grid_spec=pltpu.PrefetchScalarGridSpec(
            num_scalar_prefetch=0,
            grid=(B,),                 # >= 2 parallel steps: feeds both v7x TCs
            in_specs=[
                pl.BlockSpec((1, T, C), lambda b: (b, 0, 0)),      # x
                pl.BlockSpec((1, T_enc, C), lambda b: (b, 0, 0)),  # enc
                const((C, C)),          # W_q
                const((C, 1)),          # b_q
                const((2 * C, C)),      # [W_k; W_v]
                const((2 * C, 1)),      # [b_k; b_v]
                const((C, C)),          # W_o
                const((C, 1)),          # b_o
            ],
            out_specs=pl.BlockSpec((1, T, C), lambda b: (b, 0, 0)),
        ),
        compiler_params=pltpu.CompilerParams(
            dimension_semantics=("parallel",),
            # Tiny working set; well under the v7x 64 MiB physical VMEM.
            vmem_limit_bytes=32 * 1024 * 1024,
        ),
    )(x, enc, wq, bq_c, wkv, bkv_c, wo, bo_c)


def reference_cross_attention(x, enc, params, *, n_heads: int):
    B, T, C = x.shape
    _, T_enc, _ = enc.shape
    d_k = C // n_heads

    def lin(a, w, b):
        return a @ w.T + b

    Q = lin(x, params["wq"], params["bq"]).reshape(B, T, n_heads, d_k).transpose(0, 2, 1, 3)
    K = lin(enc, params["wk"], params["bk"]).reshape(B, T_enc, n_heads, d_k).transpose(0, 2, 1, 3)
    V = lin(enc, params["wv"], params["bv"]).reshape(B, T_enc, n_heads, d_k).transpose(0, 2, 1, 3)

    s = jnp.einsum("bhtd,bhkd->bhtk", Q, K) / (d_k ** 0.5)
    p = jax.nn.softmax(s, axis=-1)
    o = jnp.einsum("bhtk,bhkd->bhtd", p, V)
    o = o.transpose(0, 2, 1, 3).reshape(B, T, C)
    return lin(o, params["wo"], params["bo"])


if __name__ == "__main__":
    d_model = 32
    n_heads = 4
    B, T, T_enc = 2, 8, 16

    key = jax.random.PRNGKey(0)
    ks = jax.random.split(key, 10)

    def linear_init(kw, kb, fan_in, fan_out):
        bound = 1.0 / (fan_in ** 0.5)
        w = jax.random.uniform(kw, (fan_out, fan_in), jnp.float32, -bound, bound)
        b = jax.random.uniform(kb, (fan_out,), jnp.float32, -bound, bound)
        return w, b

    wq, bq = linear_init(ks[0], ks[1], d_model, d_model)
    wk, bk = linear_init(ks[2], ks[3], d_model, d_model)
    wv, bv = linear_init(ks[4], ks[5], d_model, d_model)
    wo, bo = linear_init(ks[6], ks[7], d_model, d_model)
    params = dict(wq=wq, bq=bq, wk=wk, bk=bk, wv=wv, bv=bv, wo=wo, bo=bo)

    x = jax.random.normal(ks[8], (B, T, d_model), jnp.float32)
    enc = jax.random.normal(ks[9], (B, T_enc, d_model), jnp.float32)

    out = cross_attention(x, enc, params, n_heads=n_heads)
    out = jax.block_until_ready(out)

    ref = reference_cross_attention(x, enc, params, n_heads=n_heads)
    assert out.shape == (B, T, d_model)
    # Tolerance slightly above 1e-4 because the softmax denominator uses the
    # EUP approximate reciprocal (rel. err ~2e-4).
    assert jnp.allclose(out, ref, atol=2e-3, rtol=2e-3), "mismatch vs JAX reference"

    print("KERNEL_OK")
</pallas_src>

<mosaic_0001>
module attributes {stable_mosaic.version = 11 : i64} {
  func.func @cross_attention_kernel(%arg0: i32, %arg1: memref<1x8x32xf32, #tpu.memory_space<vmem>>, %arg2: memref<1x16x32xf32, #tpu.memory_space<vmem>>, %arg3: memref<32x32xf32, #tpu.memory_space<vmem>>, %arg4: memref<32x1xf32, #tpu.memory_space<vmem>>, %arg5: memref<64x32xf32, #tpu.memory_space<vmem>>, %arg6: memref<64x1xf32, #tpu.memory_space<vmem>>, %arg7: memref<32x32xf32, #tpu.memory_space<vmem>>, %arg8: memref<32x1xf32, #tpu.memory_space<vmem>>, %arg9: memref<1x8x32xf32, #tpu.memory_space<vmem>>) attributes {dimension_semantics = [#tpu.dimension_semantics<parallel>], iteration_bounds = array<i64: 2>, scalar_prefetch = 0 : i64, scratch_operands = 0 : i64, tpu.core_type = #tpu.core_type<tc>, window_params = [{transform_indices = @transform_0, window_bounds = array<i64: 1, 8, 32>}, {transform_indices = @transform_1, window_bounds = array<i64: 1, 16, 32>}, {pipeline_mode = #tpu.pipeline_mode<synchronous>, transform_indices = @transform_2, window_bounds = array<i64: 32, 32>}, {pipeline_mode = #tpu.pipeline_mode<synchronous>, transform_indices = @transform_3, window_bounds = array<i64: 32, 1>}, {pipeline_mode = #tpu.pipeline_mode<synchronous>, transform_indices = @transform_4, window_bounds = array<i64: 64, 32>}, {pipeline_mode = #tpu.pipeline_mode<synchronous>, transform_indices = @transform_5, window_bounds = array<i64: 64, 1>}, {pipeline_mode = #tpu.pipeline_mode<synchronous>, transform_indices = @transform_6, window_bounds = array<i64: 32, 32>}, {pipeline_mode = #tpu.pipeline_mode<synchronous>, transform_indices = @transform_7, window_bounds = array<i64: 32, 1>}, {transform_indices = @transform_8, window_bounds = array<i64: 1, 8, 32>}]} {
    %c0 = arith.constant 0 : index
    %c0_0 = arith.constant 0 : index
    %c0_1 = arith.constant 0 : index
    %0 = vector.load %arg1[%c0, %c0_0, %c0_1] : memref<1x8x32xf32, #tpu.memory_space<vmem>>, vector<1x8x32xf32>
    %1 = vector.shape_cast %0 : vector<1x8x32xf32> to vector<8x32xf32>
    %c0_2 = arith.constant 0 : index
    %c0_3 = arith.constant 0 : index
    %c0_4 = arith.constant 0 : index
    %2 = vector.load %arg2[%c0_2, %c0_3, %c0_4] : memref<1x16x32xf32, #tpu.memory_space<vmem>>, vector<1x16x32xf32>
    %3 = vector.shape_cast %2 : vector<1x16x32xf32> to vector<16x32xf32>
    %c0_5 = arith.constant 0 : index
    %c0_6 = arith.constant 0 : index
    %4 = vector.load %arg3[%c0_5, %c0_6] : memref<32x32xf32, #tpu.memory_space<vmem>>, vector<32x32xf32>
    "tpu.trace_start"() <{level = 10 : i32, message = "ck,tk->ct"}> : () -> ()
    %cst = arith.constant dense<0.000000e+00> : vector<32x8xf32>
    %5 = tpu.matmul %4, %1, %cst {dimension_numbers = #tpu.dot_dimension_numbers<[1], [1], [0], [0], [0, 0, 1, 0], [], []>} : vector<32x32xf32>, vector<8x32xf32>, vector<32x8xf32> -> vector<32x8xf32>
    "tpu.trace_stop"() : () -> ()
    %c0_7 = arith.constant 0 : index
    %c0_8 = arith.constant 0 : index
    %6 = vector.load %arg4[%c0_7, %c0_8] : memref<32x1xf32, #tpu.memory_space<vmem>>, vector<32x1xf32>
    %7 = vector.broadcast %6 : vector<32x1xf32> to vector<32x8xf32>
    %8 = arith.addf %5, %7 : vector<32x8xf32>
    %cst_9 = arith.constant 0.353553385 : f32
    %9 = vector.broadcast %cst_9 : f32 to vector<32x8xf32>
    %10 = arith.mulf %8, %9 : vector<32x8xf32>
    %c0_10 = arith.constant 0 : index
    %c0_11 = arith.constant 0 : index
    %11 = vector.load %arg5[%c0_10, %c0_11] : memref<64x32xf32, #tpu.memory_space<vmem>>, vector<64x32xf32>
    "tpu.trace_start"() <{level = 10 : i32, message = "ck,sk->cs"}> : () -> ()
    %cst_12 = arith.constant dense<0.000000e+00> : vector<64x16xf32>
    %12 = tpu.matmul %11, %3, %cst_12 {dimension_numbers = #tpu.dot_dimension_numbers<[1], [1], [0], [0], [0, 0, 1, 0], [], []>} : vector<64x32xf32>, vector<16x32xf32>, vector<64x16xf32> -> vector<64x16xf32>
    "tpu.trace_stop"() : () -> ()
    %c0_13 = arith.constant 0 : index
    %c0_14 = arith.constant 0 : index
    %13 = vector.load %arg6[%c0_13, %c0_14] : memref<64x1xf32, #tpu.memory_space<vmem>>, vector<64x1xf32>
    %14 = vector.broadcast %13 : vector<64x1xf32> to vector<64x16xf32>
    %15 = arith.addf %12, %14 : vector<64x16xf32>
    %16 = vector.shape_cast %10 : vector<32x8xf32> to vector<4x8x8xf32>
    %17 = vector.extract_strided_slice %15 {offsets = [0, 0], sizes = [32, 16], strides = [1, 1]} : vector<64x16xf32> to vector<32x16xf32>
    %18 = vector.shape_cast %17 : vector<32x16xf32> to vector<4x8x16xf32>
    %19 = vector.extract_strided_slice %15 {offsets = [32, 0], sizes = [32, 16], strides = [1, 1]} : vector<64x16xf32> to vector<32x16xf32>
    %20 = vector.shape_cast %19 : vector<32x16xf32> to vector<4x8x16xf32>
    %21 = tpu.transpose %16, [0, 2, 1] : vector<4x8x8xf32> -> vector<4x8x8xf32>
    "tpu.trace_start"() <{level = 10 : i32, message = "htd,hds->hts"}> : () -> ()
    %cst_15 = arith.constant dense<0.000000e+00> : vector<4x8x16xf32>
    %22 = tpu.matmul %21, %18, %cst_15 {dimension_numbers = #tpu.dot_dimension_numbers<[2], [1], [1], [2], [0, 0, 0, 1, 1, 2], [0], [0]>} : vector<4x8x8xf32>, vector<4x8x16xf32>, vector<4x8x16xf32> -> vector<4x8x16xf32>
    "tpu.trace_stop"() : () -> ()
    %cst_16 = arith.constant dense<0xFF800000> : vector<4x8xf32>
    %23 = vector.multi_reduction <maximumf>, %22, %cst_16 [2] : vector<4x8x16xf32> to vector<4x8xf32>
    %24 = vector.shape_cast %23 : vector<4x8xf32> to vector<4x8x1xf32>
    %25 = vector.broadcast %24 : vector<4x8x1xf32> to vector<4x8x16xf32>
    %26 = arith.subf %22, %25 : vector<4x8x16xf32>
    %27 = math.exp %26 : vector<4x8x16xf32>
    %cst_17 = arith.constant dense<0.000000e+00> : vector<4x8xf32>
    %28 = vector.multi_reduction <add>, %27, %cst_17 [2] : vector<4x8x16xf32> to vector<4x8xf32>
    %29 = vector.shape_cast %28 : vector<4x8xf32> to vector<4x8x1xf32>
    %30 = tpu.reciprocal %29 {approx = true} : vector<4x8x1xf32> -> vector<4x8x1xf32>
    %31 = vector.broadcast %30 : vector<4x8x1xf32> to vector<4x8x16xf32>
    %32 = arith.mulf %27, %31 : vector<4x8x16xf32>
    "tpu.trace_start"() <{level = 10 : i32, message = "hds,hts->hdt"}> : () -> ()
    %cst_18 = arith.constant dense<0.000000e+00> : vector<4x8x8xf32>
    %33 = tpu.matmul %20, %32, %cst_18 {dimension_numbers = #tpu.dot_dimension_numbers<[2], [2], [1], [1], [0, 0, 0, 1, 1, 1], [0], [0]>} : vector<4x8x16xf32>, vector<4x8x16xf32>, vector<4x8x8xf32> -> vector<4x8x8xf32>
    "tpu.trace_stop"() : () -> ()
    %34 = vector.shape_cast %33 : vector<4x8x8xf32> to vector<32x8xf32>
    %c0_19 = arith.constant 0 : index
    %c0_20 = arith.constant 0 : index
    %35 = vector.load %arg7[%c0_19, %c0_20] : memref<32x32xf32, #tpu.memory_space<vmem>>, vector<32x32xf32>
    %cst_21 = arith.constant dense<0.000000e+00> : vector<32x8xf32>
    %36 = tpu.matmul %35, %34, %cst_21 {dimension_numbers = #tpu.dot_dimension_numbers<[1], [0], [0], [1], [0, 0, 1, 1], [], []>} : vector<32x32xf32>, vector<32x8xf32>, vector<32x8xf32> -> vector<32x8xf32>
    %c0_22 = arith.constant 0 : index
    %c0_23 = arith.constant 0 : index
    %37 = vector.load %arg8[%c0_22, %c0_23] : memref<32x1xf32, #tpu.memory_space<vmem>>, vector<32x1xf32>
    %38 = vector.broadcast %37 : vector<32x1xf32> to vector<32x8xf32>
    %39 = arith.addf %36, %38 : vector<32x8xf32>
    %40 = tpu.transpose %39, [1, 0] : vector<32x8xf32> -> vector<8x32xf32>
    %c0_24 = arith.constant 0 : index
    %c0_25 = arith.constant 0 : index
    %c0_26 = arith.constant 0 : index
    %41 = vector.load %arg9[%c0_24, %c0_25, %c0_26] : memref<1x8x32xf32, #tpu.memory_space<vmem>>, vector<1x8x32xf32>
    %42 = vector.shape_cast %41 : vector<1x8x32xf32> to vector<8x32xf32>
    %43 = vector.shape_cast %40 : vector<8x32xf32> to vector<1x8x32xf32>
    tpu.vector_store %arg9[%c0_24, %c0_25, %c0_26], %43 {strides = array<i32>} : memref<1x8x32xf32, #tpu.memory_space<vmem>>, vector<1x8x32xf32>,
    return
  }
  func.func @transform_0(%arg0: i32) -> (i32, i32, i32) {
    %c0_i32 = arith.constant 0 : i32
    %c0_i32_0 = arith.constant 0 : i32
    %c0_i32_1 = arith.constant 0 : i32
    return %arg0, %c0_i32, %c0_i32_0 : i32, i32, i32
  }
  func.func @transform_1(%arg0: i32) -> (i32, i32, i32) {
    %c0_i32 = arith.constant 0 : i32
    %c0_i32_0 = arith.constant 0 : i32
    %c0_i32_1 = arith.constant 0 : i32
    return %arg0, %c0_i32, %c0_i32_0 : i32, i32, i32
  }
  func.func @transform_2(%arg0: i32) -> (i32, i32) {
    %c0_i32 = arith.constant 0 : i32
    %c0_i32_0 = arith.constant 0 : i32
    %c0_i32_1 = arith.constant 0 : i32
    return %c0_i32, %c0_i32_0 : i32, i32
  }
  func.func @transform_3(%arg0: i32) -> (i32, i32) {
    %c0_i32 = arith.constant 0 : i32
    %c0_i32_0 = arith.constant 0 : i32
    %c0_i32_1 = arith.constant 0 : i32
    return %c0_i32, %c0_i32_0 : i32, i32
  }
  func.func @transform_4(%arg0: i32) -> (i32, i32) {
    %c0_i32 = arith.constant 0 : i32
    %c0_i32_0 = arith.constant 0 : i32
    %c0_i32_1 = arith.constant 0 : i32
    return %c0_i32, %c0_i32_0 : i32, i32
  }
  func.func @transform_5(%arg0: i32) -> (i32, i32) {
    %c0_i32 = arith.constant 0 : i32
    %c0_i32_0 = arith.constant 0 : i32
    %c0_i32_1 = arith.constant 0 : i32
    return %c0_i32, %c0_i32_0 : i32, i32
  }
  func.func @transform_6(%arg0: i32) -> (i32, i32) {
    %c0_i32 = arith.constant 0 : i32
    %c0_i32_0 = arith.constant 0 : i32
    %c0_i32_1 = arith.constant 0 : i32
    return %c0_i32, %c0_i32_0 : i32, i32
  }
  func.func @transform_7(%arg0: i32) -> (i32, i32) {
    %c0_i32 = arith.constant 0 : i32
    %c0_i32_0 = arith.constant 0 : i32
    %c0_i32_1 = arith.constant 0 : i32
    return %c0_i32, %c0_i32_0 : i32, i32
  }
  func.func @transform_8(%arg0: i32) -> (i32, i32, i32) {
    %c0_i32 = arith.constant 0 : i32
    %c0_i32_0 = arith.constant 0 : i32
    %c0_i32_1 = arith.constant 0 : i32
    return %arg0, %c0_i32, %c0_i32_0 : i32, i32, i32
  }
}

</mosaic_0001>

<bundles_post_ra>
// kernel: tpu_custom_call.1
= control target key start
LH: loop header
LB: loop body
LE: loop exit
PB: predicated region body
PF: predicated region fallthrough
CT: control target
= control target key end

     0   :  { %13 = vsyncpa [#allocation3], 0  ;;  %s1531_s0 = inlined_call_operand.vmem [shape: f32[2,8,32], index: 0, kind: input, shape index: {}]   ;;  %s1532_s1 = inlined_call_operand.vmem [shape: f32[2,16,32], index: 1, kind: input, shape index: {}]   ;;  %s1533_s2 = inlined_call_operand.vmem [shape: f32[32,32], index: 2, kind: input, shape index: {}]   ;;  %s1534_s3 = inlined_call_operand.vmem [shape: f32[32,1], index: 3, kind: input, shape index: {}]   ;;  %s1535_s4 = inlined_call_operand.vmem [shape: f32[64,32], index: 4, kind: input, shape index: {}]   ;;  %s1536_s5 = inlined_call_operand.vmem [shape: f32[64,1], index: 5, kind: input, shape index: {}]   ;;  %s1537_s6 = inlined_call_operand.vmem [shape: f32[32,32], index: 6, kind: input, shape index: {}]   ;;  %s1538_s7 = inlined_call_operand.vmem [shape: f32[32,1], index: 7, kind: input, shape index: {}]   ;;  %s1539_s8 = inlined_call_operand.hbm [shape: f32[2,8,32], index: 8, kind: output, shape index: {}]  }
   0x1   :  { %15 = vsyncpa [#allocation3 + $0x1], 0  ;;  %s1303_s27 = smov 0   ;;  %s1305_s28 = smov 0  }
   0x2   :  { %s1307_s29 = smov 0   ;;  %s1309_s30 = smov 0  }
   0x3 LB: > { %s1324_s9 = sadd.s32 4294967295, %s1255_s30   ;;  %s1087_s10 = sadd.s32 4294967294, %s1255_s30   ;;  %s1255_s30 = sphi %s1309_s30, %s1545_s30   ;;  %s1251_s29 = sphi %s1307_s29, %s1544_s29   ;;  %s1247_s28 = sphi %s1305_s28, %s1543_s28   ;;  %s1243_s27 = sphi %s1303_s27, %s1542_s27  }
   0x4   : > { %s1328_s11 = sadd.s32 1, %s1255_s30   ;;  %s206_s12 = sadd.s32 1, %s1251_s29 }
   0x5   : > { %s203_s13 = ssub.s32 %s1255_s30, %s1328_s11  ;;  %p216_p0 = scmp.ne.s32.totalorder %s1251_s29, %s1247_s28 }
   0x6   : > { %p204_p1 = scmp.eq.s32.totalorder %s203_s13, 0  ;;  %p217_p2 = scmp.eq.s32.totalorder %s1324_s9, 1 }
   0x7   : > { %p222_p3 = scmp.ne.s32.totalorder %s1247_s28, %s1243_s27  ;;  %p223_p4 = scmp.eq.s32.totalorder %s1087_s10, 1 }
   0x8   : > { %s1339_s14 = scalar_select %p204_p1, %s1251_s29, %s206_s12  }
   0x9   : > { %p1341_p5 = por %p217_p2, %p216_p0  ;;  %p1345_p6 = por %p223_p4, %p222_p3 }
   0xa   : > { %p1090_p7 = scmp.ge.s32.totalorder %s1255_s30, 1  ;;  %p274_p8 = scmp.lt.s32.totalorder %s1255_s30, 3 }
   0xc   : > { %p275_p9 = pnand %p1090_p7, %p274_p8 }
   0xd   : > { %p312_p10 = scmp.lt.s32.totalorder (!%p275_p9), %s1324_s9, 1  ;;  %s309_s25 = sand.u32 (!%p275_p9), 1, %s1247_s28  }
   0xe   : > { %278 = sbr.rel (%p275_p9) target bundleno = 1183 (0x49f), region = 52  ;;  %s1127_s10 = sshll.u32 (!%p275_p9), %s1324_s9, 3 }
   0xf   : > { %s1011_s17 = scalar_lea.hbm (!%p275_p9), %s1539_s8, %s1127_s10  ;;  %s1001_s21 = scalar_lea.sflag (!%p275_p9), [#allocation3], %s309_s25 }
  0x10   : > { %s1213_s10 = scalar_lea.hbm (!%p275_p9), %s1539_s8, 16 }
  0x13   : > { %v329_v0 = vld [vmem:[%s1534_s3 + $0x8] sm:$0xff]  ;;  %v1257_v1 = vmov 0   ;;  %s313_s19 = scalar_select %p312_p10, %s1324_s9, 1  ;;  %v331_v2 = vld [vmem:[%s1534_s3 + $0x18] sm:$0xff]  ;;  %vm352_vm0 = vcmask 261120   ;;  %v324_v5 = vld [vmem:[%s1533_s2] sm:$0xff] }
  0x14   : > { %1174 = vset.pattern.permute.xlu0 %v1257_v1  ;;  %1175 = vset.pattern.permute.xlu1 %v1257_v1  ;;  %v328_v6 = vld [vmem:[%s1534_s3] sm:$0xff]  ;;  %v410_v7 = vld [vmem:[%s1536_s5 + $0x8] sm:$0xff]  ;;  %v330_v9 = vld [vmem:[%s1534_s3 + $0x10] sm:$0xff]  ;;  %vm656_vm1 = vcmask 64512   ;;  %vm749_vm2 = vcmask 130048  }
  0x15   : > { %339 = vperm.xlu0 %1174, %v329_v0   ;;  %1176 = vset.pattern.permute.xlu2 %v1257_v1  ;;  %s1092_s22 = sshll.u32 %s313_s19, 3  ;;  %s1130_s23 = sshll.u32 %s313_s19, 4  ;;  %v401_v10 = vld [vmem:[%s1535_s4] sm:$0xff]  ;;  %v325_v12 = vld [vmem:[%s1533_s2 + $0x8] sm:$0xff]  ;;  %v412_v13 = vld [vmem:[%s1536_s5 + $0x18] sm:$0xff] }
  0x16   : > { %349 = vperm.xlu1 %1175, %v331_v2   ;;  %s315_s26 = scalar_lea.vmem %s1531_s0, %s1092_s22  ;;  %s320_s13 = scalar_lea.vmem %s1532_s1, %s1130_s23  ;;  %424 = vperm.xlu2 %1176, %v410_v7   ;;  %v409_v11 = vld [vmem:[%s1536_s5] sm:$0xff]  ;;  %v411_v14 = vld [vmem:[%s1536_s5 + $0x10] sm:$0xff]  ;;  %v402_v15 = vld [vmem:[%s1535_s4 + $0x8] sm:$0xff] }
  0x17   : > { %v321_v3 = vld [vmem:[%s315_s26] sm:$0xff]  ;;  %v323_v4 = vld [vmem:[%s320_s13 + $0x8] sm:$0xff]  ;;  %v326_v16 = vld [vmem:[%s1533_s2 + $0x10] sm:$0xff]  ;;  %s1091_s26 = sshll.u32 %s309_s25, 3  ;;  %s1015_s19 = sshll.u32 %s1011_s17, 4  ;;  %s1016_s19 = int_to_ptr.hbm [resolvable:$true] %s1015_s19 }
  0x18   : > { %1095 = vmatpush.xpose.msk.msra.mxu0 %vm352_vm0, %v321_v3  ;;  %1100 = vmatpush.xpose.msk.msra.mxu1 %vm352_vm0, %v323_v4  ;;  %v322_v8 = vld [vmem:[%s320_s13] sm:$0xff]  ;;  %v403_v17 = vld [vmem:[%s1535_s4 + $0x10] sm:$0xff]  ;;  %v327_v18 = vld [vmem:[%s1533_s2 + $0x18] sm:$0xff]  ;;  %s311_s18 = scalar_lea.vmem [#allocation2], %s1091_s26  ;;  %s1207_s22 = sshra.s32 %s1016_s19, 4  ;;  %s1208_s22 = int_to_ptr.hbm [resolvable:$true] %s1207_s22 }
  0x19   : > { %1131 = vmatpush.xpose.msk.msra.mxu3 %vm352_vm0, %v323_v4  ;;  %v404_v19 = vld [vmem:[%s1535_s4 + $0x18] sm:$0xff]  ;;  %v407_v22 = vld [vmem:[%s1535_s4 + $0x30] sm:$0xff]  ;;  %v405_v54 = vld [vmem:[%s1535_s4 + $0x20] sm:$0xff]  ;;  %s1013_s20 = sshll.u32 %s311_s18, 4  ;;  %s1209_s23 = scalar_lea.hbm %s1208_s22, 8  ;;  %s1014_s20 = int_to_ptr.vmem [resolvable:$true] %s1013_s20 }
  0x1a   : > { %v408_v29 = vld [vmem:[%s1535_s4 + $0x38] sm:$0xff]  ;;  %v413_v0 = vld [vmem:[%s1536_s5 + $0x20] sm:$0xff]  ;;  %v406_v2 = vld [vmem:[%s1535_s4 + $0x28] sm:$0xff]  ;;  %p1210_p11 = scmp.ne.s32.totalorder %s1208_s22, %s1209_s23  ;;  %p1214_p0 = scmp.lt.s32.totalorder %s1208_s22, %s1539_s8 }
  0x1b   : > { %1096 = vmatmul.msk.f32.vlgmr.msra.gmra.mxu0 %vm352_vm0, %v324_v5  ;;  %p1215_p1 = scmp.lt.s32.totalorder %s1213_s10, %s1209_s23 }
  0x1c   : > { %1101 = vmatpush.xpose.msk.msra.mxu1 %vm352_vm0, %v322_v8  ;;  %p1211_p12 = pnand %p1210_p11, %p1341_p5 }
  0x1d   : > { %334 = vperm.xlu0 %1174, %v328_v6   ;;  %1132 = vmatpush.xpose.msk.msra.mxu3 %vm352_vm0, %v322_v8  ;;  %p1216_p2 = por %p1215_p1, %p1214_p0 }
  0x1e   : > { %344 = vperm.xlu1 %1175, %v330_v9   ;;  %419 = vperm.xlu2 %1176, %v409_v11   ;;  %p1212_p13 = pneg %p1211_p12 }
  0x1f   : > { %1102 = vmatmul.msk.f32.vlgmr.msra.gmra.mxu1 %vm352_vm0, %v401_v10 }
  0x20   : > { %1108 = vmatmul.msk.f32.vlgmr.msra.gmra.mxu3 %vm352_vm0, %v407_v22  ;;  %p1217_p3 = pnand %p1216_p2, %p1212_p13 }
  0x23   : > { %1097 = vmatmul.msk.f32.gmra.mxu0 %vm352_vm0, %v325_v12 }
  0x25   : > { %434 = vperm.xlu0 %1174, %v412_v13  }
  0x26   : > { %429 = vperm.xlu1 %1175, %v411_v14  }
  0x27   : > { %1103 = vmatmul.msk.f32.gmra.mxu1 %vm352_vm0, %v402_v15 }
  0x28   : > { %1109 = vmatmul.msk.f32.gmra.mxu3 %vm352_vm0, %v408_v29  ;;  %v904_v29 = vld [vmem:[%s1538_s7 + $0x10] sm:$0xff] }
  0x2b   : > { %1098 = vmatmul.msk.f32.gmra.mxu0 %vm352_vm0, %v326_v16 }
  0x2f   : > { %1104 = vmatmul.msk.f32.gmra.mxu1 %vm352_vm0, %v403_v17 }
  0x33   : > { %1099 = vmatmul.msk.f32.gmra.mxu0 %vm352_vm0, %v327_v18 }
  0x37   : > { %1105 = vmatmul.msk.f32.gmra.mxu1 %vm352_vm0, %v404_v19 }
  0x3f   : > { %1106 = vmatmul.msk.f32.gmra.mxu1 %vm352_vm0, %v405_v54 }
  0x47   : > { %1107 = vmatmul.msk.f32.gmra.mxu1 %vm352_vm0, %v406_v2 }
  0x70   : > { %v425_v21 = vpop.permute.xlu2 %424 }
  0x78   : > { %v420_v27 = vpop.permute.xlu2 %419 }
  0x87   : > { %v340_v20 = vpop.permute.xlu0 %339 }
  0x88   : > { %v350_v24 = vpop.permute.xlu1 %349 }
  0x8f   : > { %v335_v23 = vpop.permute.xlu0 %334 }
  0x90   : > { %v345_v33 = vpop.permute.xlu1 %344 }
  0x97   : > { %v435_v47 = vpop.permute.xlu0 %434 }
  0x98   : > { %v385_v25 = vpop.f32.mrf.mxu0  ;;  %v430_v40 = vpop.permute.xlu1 %429 }
  0x99   : > { %v386_v26 = vadd.f32 %v385_v25, %v335_v23  ;;  %v416_v25 = vld [vmem:[%s1536_s5 + $0x38] sm:$0xff] }
  0x9b   : > { %v397_v28 = vmul.f32 0.35355338, %v386_v26  ;;  %v905_v26 = vld [vmem:[%s1538_s7 + $0x18] sm:$0xff] }
  0x9c   : > { %v504_v30 = vpop.f32.mrf.mxu1 }
  0x9d   : > { %528 = vxpose.xlu0.b32.start.end [1/1] (short) (narrow) %v397_v28, 8  ;;  %v505_v31 = vadd.f32 %v504_v30, %v420_v27  ;;  %v903_v27 = vld [vmem:[%s1538_s7 + $0x8] sm:$0xff]  ;;  %v415_v28 = vld [vmem:[%s1536_s5 + $0x30] sm:$0xff] }
  0x9f   : > { %675 = vmatpush.msrb.mxu0 %v505_v31 }
  0xa0   : > { %v388_v32 = vpop.f32.mrf.mxu0 }
  0xa1   : > { %v389_v34 = vadd.f32 %v388_v32, %v340_v20 }
  0xa3   : > { %v398_v35 = vmul.f32 0.35355338, %v389_v34  ;;  %v1432_v55 = vpop.f32.mrf.mxu3 }
  0xa4   : > { %v507_v36 = vpop.f32.mrf.mxu1 }
  0xa5   : > { %560 = vxpose.xlu2.b32.start.end [1/1] (short) (narrow) %v398_v35, 8  ;;  %v508_v37 = vadd.f32 %v507_v36, %v425_v21  ;;  %v414_v21 = vld [vmem:[%s1536_s5 + $0x28] sm:$0xff] }
  0xa7   : > { %698 = vmatpush.msrb.mxu3 %v508_v37 }
  0xa8   : > { %v391_v38 = vpop.f32.mrf.mxu0 }
  0xa9   : > { %v392_v39 = vadd.f32 %v391_v38, %v345_v33 }
  0xab   : > { %v399_v41 = vmul.f32 0.35355338, %v392_v39  ;;  %v1434_v56 = vpop.f32.mrf.mxu3 }
  0xac   : > { %v510_v42 = vpop.f32.mrf.mxu1 }
  0xad   : > { %592 = vxpose.xlu2.b32.start.end [1/1] (short) (narrow) %v399_v41, 8  ;;  %v511_v43 = vadd.f32 %v510_v42, %v430_v40 }
  0xaf   : > { %721 = vmatpush.msra.mxu0 %v511_v43 }
  0xb0   : > { %v394_v44 = vpop.f32.mrf.mxu0 }
  0xb1   : > { %v395_v45 = vadd.f32 %v394_v44, %v350_v24  ;;  %v902_v24 = vld [vmem:[%s1538_s7] sm:$0xff] }
  0xb3   : > { %v400_v46 = vmul.f32 0.35355338, %v395_v45 }
  0xb4   : > { %v513_v48 = vpop.f32.mrf.mxu1 }
  0xb5   : > { %v514_v49 = vadd.f32 %v513_v48, %v435_v47  ;;  %624 = vxpose.xlu1.b32.start.end [1/1] (short) (narrow) %v400_v46, 8 }
  0xb7   : > { %744 = vmatpush.msra.mxu3 %v514_v49 }
  0xbc   : > { %v516_v31 = vpop.f32.mrf.mxu1 }
  0xc4   : > { %v519_v37 = vpop.f32.mrf.mxu1 }
 0x13e   : > { %v576_v50 = vpop.trf.xlu2 }
 0x13f   : > { %1111 = vmatmul.msk.f32.vlgmr.msrb.gmra.mxu3 %vm656_vm1, %v576_v50 }
 0x141   : > { %v544_v51 = vpop.trf.xlu0 }
 0x142   : > { %1110 = vmatmul.msk.f32.vlgmr.msrb.gmra.mxu0 %vm656_vm1, %v544_v51 }
 0x146   : > { %v608_v52 = vpop.trf.xlu2 }
 0x14a   : > { %1112 = vmatmul.msk.f32.vlgmr.msra.gmra.mxu0 %vm656_vm1, %v608_v52 }
 0x159   : > { %v640_v53 = vpop.trf.xlu1 }
 0x15a   : > { %1113 = vmatmul.msk.f32.vlgmr.msra.gmra.mxu3 %vm656_vm1, %v640_v53 }
 0x1bf   : > { %v677_v57 = vpop.f32.mrf.mxu0 }
 0x1c0   : > { %v750_v58 = vsel %vm749_vm2, %v677_v57, -inf }
 0x1c1   : > { %751 = vmax.xlane.f32.xlu2 %v750_v58  ;;  %v898_v58 = vld [vmem:[%s1537_s6] sm:$0xff] }
 0x1c2   : > { %v700_v59 = vpop.f32.mrf.mxu3 }
 0x1c3   : > { %v753_v60 = vsel %vm749_vm2, %v700_v59, -inf }
 0x1c4   : > { %754 = vmax.xlane.f32.xlu0 %v753_v60 }
 0x1c7   : > { %v723_v61 = vpop.f32.mrf.mxu0 }
 0x1c8   : > { %v756_v62 = vsel %vm749_vm2, %v723_v61, -inf }
 0x1cc   : > { %757 = vmax.xlane.f32.xlu0 %v756_v62 }
 0x1dd   : > { %v746_v63 = vpop.f32.mrf.mxu3 }
 0x1de   : > { %v759_v1 = vsel %vm749_vm2, %v746_v63, -inf }
 0x1df   : > { %760 = vmax.xlane.f32.xlu1 %v759_v1 }
 0x1e0   : > { %439 = vperm.xlu0 %1174, %v413_v0  }
 0x234   : > { %v752_v3 = vpop.xlane.xlu2 %751 }
 0x235   : > { %v762_v4 = vsub.f32 %v677_v57, %v752_v3 }
 0x237   : > { %v766_v5 = vmul.f32 1.442695, %v762_v4  ;;  %v755_v6 = vpop.xlane.xlu0 %754 }
 0x238   : > { %v763_v7 = vsub.f32 %v700_v59, %v755_v6  ;;  %v901_v59 = vld [vmem:[%s1537_s6 + $0x18] sm:$0xff] }
 0x239   : > { %1177 = vpow2.f32 %v766_v5 }
 0x23a   : > { %v768_v8 = vmul.f32 1.442695, %v763_v7 }
 0x23c   : > { %1179 = vpow2.f32 %v768_v8 }
 0x23f   : > { %v1178_v9 = vpop.eup %1177  ;;  %v758_v10 = vpop.xlane.xlu0 %757 }
 0x240   : > { %v764_v11 = vsub.f32 %v723_v61, %v758_v10  ;;  %v774_v12 = vsel %vm749_vm2, %v1178_v9, 0.0 }
 0x241   : > { %775 = vadd.xlane.f32.xlu2 %v774_v12 }
 0x242   : > { %v1180_v13 = vpop.eup %1179  ;;  %v770_v14 = vmul.f32 1.442695, %v764_v11 }
 0x243   : > { %v777_v15 = vsel %vm749_vm2, %v1180_v13, 0.0 }
 0x244   : > { %1181 = vpow2.f32 %v770_v14  ;;  %778 = vadd.xlane.f32.xlu1 %v777_v15 }
 0x24a   : > { %v1182_v16 = vpop.eup %1181 }
 0x24b   : > { %v780_v17 = vsel %vm749_vm2, %v1182_v16, 0.0 }
 0x24c   : > { %781 = vadd.xlane.f32.xlu1 %v780_v17 }
 0x252   : > { %v761_v18 = vpop.xlane.xlu1 %760  ;;  %v440_v34 = vpop.permute.xlu0 %439 }
 0x253   : > { %v765_v19 = vsub.f32 %v746_v63, %v761_v18  ;;  %v517_v38 = vadd.f32 %v516_v31, %v440_v34 }
 0x255   : > { %v772_v20 = vmul.f32 1.442695, %v765_v19 }
 0x257   : > { %1183 = vpow2.f32 %v772_v20 }
 0x259   : > { %444 = vperm.xlu2 %1176, %v414_v21  }
 0x25d   : > { %v1184_v22 = vpop.eup %1183 }
 0x25e   : > { %v783_v23 = vsel %vm749_vm2, %v1184_v22, 0.0 }
 0x25f   : > { %784 = vadd.xlane.f32.xlu0 %v783_v23 }
 0x261   : > { %908 = vperm.xlu2 %1176, %v902_v24  }
 0x265   : > { %454 = vperm.xlu1 %1175, %v416_v25  }
 0x269   : > { %923 = vperm.xlu2 %1176, %v905_v26  }
 0x26d   : > { %913 = vperm.xlu1 %1175, %v903_v27  }
 0x273   : > { %449 = vperm.xlu0 %1174, %v415_v28  }
 0x27b   : > { %918 = vperm.xlu0 %1174, %v904_v29  }
 0x2b4   : > { %v776_v30 = vpop.xlane.xlu2 %775 }
 0x2b5   : > { %1185 = vrcp.f32 %v776_v30 }
 0x2b7   : > { %v779_v32 = vpop.xlane.xlu1 %778 }
 0x2b8   : > { %1187 = vrcp.f32 %v779_v32 }
 0x2bb   : > { %v1186_v33 = vpop.eup %1185 }
 0x2bc   : > { %v790_v35 = vmul.f32 %v1186_v33, %v1178_v9  ;;  %v445_v40 = vpop.permute.xlu2 %444 }
 0x2bd   : > { %v520_v42 = vadd.f32 %v519_v37, %v445_v40 }
 0x2be   : > { %v1188_v36 = vpop.eup %1187  ;;  %1114 = vmatpush.xpose.msk.msra.mxu2 %vm749_vm2, %v790_v35 }
 0x2bf   : > { %v791_v39 = vmul.f32 %v1188_v36, %v1180_v13  ;;  %v782_v41 = vpop.xlane.xlu1 %781 }
 0x2c0   : > { %1189 = vrcp.f32 %v782_v41 }
 0x2c1   : > { %1115 = vmatmul.msk.f32.vlgmr.msra.gmra.mxu2 %vm749_vm2, %v517_v38  ;;  %1116 = vmatpush.xpose.msk.msrb.mxu3 %vm749_vm2, %v791_v39 }
 0x2c4   : > { %1117 = vmatmul.msk.f32.vlgmr.msrb.gmra.mxu3 %vm749_vm2, %v520_v42  ;;  %v909_v60 = vpop.permute.xlu2 %908 }
 0x2c6   : > { %v1190_v43 = vpop.eup %1189 }
 0x2c7   : > { %v792_v44 = vmul.f32 %v1190_v43, %v1182_v16 }
 0x2c9   : > { %1118 = vmatpush.xpose.msk.msrb.mxu2 %vm749_vm2, %v792_v44 }
 0x2cc   : > { %v924_v5 = vpop.permute.xlu2 %923 }
 0x2d2   : > { %v785_v45 = vpop.xlane.xlu0 %784 }
 0x2d3   : > { %1191 = vrcp.f32 %v785_v45 }
 0x2d7   : > { %v455_v48 = vpop.permute.xlu1 %454 }
 0x2d8   : > { %v526_v49 = vadd.f32 %v1434_v56, %v455_v48  ;;  %v900_v56 = vld [vmem:[%s1537_s6 + $0x10] sm:$0xff] }
 0x2d9   : > { %v1192_v46 = vpop.eup %1191 }
 0x2da   : > { %v793_v47 = vmul.f32 %v1192_v46, %v1184_v22 }
 0x2dc   : > { %1120 = vmatpush.xpose.msk.msra.mxu3 %vm749_vm2, %v793_v47 }
 0x2df   : > { %1121 = vmatmul.msk.f32.vlgmr.msra.gmra.mxu3 %vm749_vm2, %v526_v49  ;;  %v914_v63 = vpop.permute.xlu1 %913 }
 0x2e5   : > { %v450_v50 = vpop.permute.xlu0 %449 }
 0x2e6   : > { %v523_v51 = vadd.f32 %v1432_v55, %v450_v50  ;;  %v899_v55 = vld [vmem:[%s1537_s6 + $0x8] sm:$0xff] }
 0x2e8   : > { %1119 = vmatmul.msk.f32.vlgmr.msrb.gmra.mxu2 %vm749_vm2, %v523_v51 }
 0x2ed   : > { %v919_v2 = vpop.permute.xlu0 %918 }
 0x344   : > { %v817_v54 = vpop.f32.mrf.mxu2 }
 0x347   : > { %v843_v52 = vpop.f32.mrf.mxu3 }
 0x362   : > { %v895_v53 = vpop.f32.mrf.mxu3 }
 0x363   : > { %950 = vmatpush.msra.mxu2 %v895_v53 }
 0x36b   : > { %v869_v57 = vpop.f32.mrf.mxu2 }
 0x36c   : > { %951 = vmatpush.msra.mxu2 %v869_v57 }
 0x36e   : > { %952 = vmatpush.msra.mxu2 %v843_v52 }
 0x370   : > { %953 = vmatpush.msra.mxu2 %v817_v54 }
 0x371   : > { %1122 = vmatmul.msk.f32.vlgmr.msra.gmra.mxu2 %vm352_vm0, %v898_v58 }
 0x379   : > { %1123 = vmatmul.msk.f32.gmra.mxu2 %vm352_vm0, %v899_v55 }
 0x381   : > { %1124 = vmatmul.msk.f32.gmra.mxu2 %vm352_vm0, %v900_v56 }
 0x389   : > { %1125 = vmatmul.msk.f32.gmra.mxu2 %vm352_vm0, %v901_v59 }
 0x3f4   : > { %v955_v61 = vpop.f32.mrf.mxu2 }
 0x3f5   : > { %v956_v62 = vadd.f32 %v955_v61, %v909_v60 }
 0x3f7   : > { %967 = vxpose.xlu1.b32.start [1/4] (short) (narrow) %v956_v62, 8 }
 0x3fc   : > { %v958_v0 = vpop.f32.mrf.mxu2 }
 0x3fd   : > { %v959_v1 = vadd.f32 %v958_v0, %v914_v63 }
 0x3ff   : > { %968 = vxpose.xlu1.b32.cont [2/4] (short) (narrow) %v959_v1, 8 }
 0x404   : > { %v961_v3 = vpop.f32.mrf.mxu2 }
 0x405   : > { %v962_v4 = vadd.f32 %v961_v3, %v919_v2 }
 0x407   : > { %969 = vxpose.xlu1.b32.cont [3/4] (short) (narrow) %v962_v4, 8 }
 0x40c   : > { %v964_v6 = vpop.f32.mrf.mxu2 }
 0x40d   : > { %v965_v7 = vadd.f32 %v964_v6, %v924_v5 }
 0x40f   : > { %970 = vxpose.xlu1.b32.end [4/4] (short) (narrow) %v965_v7, 8 }
 0x49b   : > { %v983_v8 = vpop.trf.xlu1 }
 0x49c   : > { %999 = vst.msk [vmem:[%s311_s18] sm:$0xff] %vm352_vm0, %v983_v8 }
 0x49d   : > { %1220 = shalt.err (!%p1217_p3)
}
 0x49e   : > { %1133 = dma.vmem_to_hbm [thread:$0]  (%p1341_p5), %s1014_s20, 128, %s1016_s19, %s1001_s21  }
 0x49f PF: > { %p1139_p4 = scmp.ge.s32.totalorder %s1255_s30, 2  ;;  %s1027_s25 = sand.u32 1, %s1243_s27  }
 0x4a0   : > { %s1028_s13 = scalar_lea.sflag [#allocation3], %s1027_s25 }
 0x4a1   : > { %p1136_p7 = pnand %p1139_p4, %p1345_p6 }
 0x4a3   : > { %p1137_p8 = pneg %p1136_p7 }
 0x4a5   : > { %1238 = dma.done.wait (%p1137_p8), %s1028_s13, 128  }
 0x4a6   : > { %1240 = vsyncadd (%p1137_p8), %s1028_s13, 4294967168  ;;  %p18_p9 = scmp.ge.s32.totalorder %s1328_s11, 4   ;;  %s1542_s27 = smov %s1247_s28 }
 0x4a7   : > { %s1543_s28 = smov %s1251_s29  ;;  %s1544_s29 = smov %s1339_s14 }
 0x4a8   : > { %s1545_s30 = smov %s1328_s11  ;;  %20 = sbr.rel (!%p18_p9) target bundleno = 3 (0x3), region = 90 }
 0x4ad   :  { %1034 = vsyncpa [#allocation3], 1 }
 0x4ae   :  { %1036 = vsyncpa [#allocation3 + $0x1], 1 }

</bundles_post_ra>
